<compile_context>
chip_gen: v5e
topology: v5e:2x2
jax: 0.10.0
libtpu: 0.0.40
codegen_flags: <defaults>
</compile_context>

<pallas_src>
import jax
import jax.numpy as jnp
import numpy as np
from jax.experimental import pallas as pl
from jax.experimental.pallas import tpu as pltpu

_LANES = 128     # vreg lane width
_SUBLANES = 8    # f32 sublanes per vreg


def _make_fusion_kernel(num):
    """Weighted sum over the leading `num` axis of a lane-dense block."""
    def kernel(w_ref, x_ref, o_ref):
        # w_ref: (num,) f32 in SMEM; x_ref: (num, TP, 128); o_ref: (TP, 128)
        acc = w_ref[0] * x_ref[0]
        for i in range(1, num):            # num is small & static -> unrolled
            acc = acc + w_ref[i] * x_ref[i]
        o_ref[...] = acc
    return kernel


class FusionLayerPallas:
    """Pallas port of FusionLayer(num)."""

    def __init__(self, num=6, key=None):
        if key is None:
            key = jax.random.PRNGKey(0)
        self.num = num
        # Mirrors nn.Parameter(torch.randn(num)); forward() overwrites it with
        # 1/num every call, so these values never reach the output.
        self.weights = jax.random.normal(key, (num,), jnp.float32)

    @staticmethod
    def _pick_tile(P, cap=1024):
        """Largest divisor of P that is a multiple of 8 and <= cap (rows)."""
        tp = min(P, cap)
        tp -= tp % _SUBLANES
        tp = max(tp, _SUBLANES)
        while P % tp:
            tp -= _SUBLANES
        # Keep at least a 2-wide parallel grid so v7x's two TensorCores both
        # get work (harmless sequential loop on v5e/v6e).
        if P // tp == 1 and P % (2 * _SUBLANES) == 0:
            tp = P // 2
        return tp

    def __call__(self, x):
        num = self.num
        assert x.shape[0] == num, "leading axis of x must equal num"

        # forward() resets the weights to the uniform average every call.
        w = jnp.full((num,), 1.0 / num, jnp.float32)

        out_shape = x.shape[1:]
        out_dtype = x.dtype
        total = int(np.prod(out_shape))

        # ---- lane-dense repack: (num, total) -> (num, P, 128), P % 8 == 0 ----
        pad = (-total) % (_SUBLANES * _LANES)
        xf = x.reshape(num, total).astype(jnp.float32)
        if pad:
            xf = jnp.pad(xf, ((0, 0), (0, pad)))
        P = (total + pad) // _LANES
        xf = xf.reshape(num, P, _LANES)

        TP = self._pick_tile(P)
        grid = (P // TP,)

        out = pl.pallas_call(
            _make_fusion_kernel(num),
            out_shape=jax.ShapeDtypeStruct((P, _LANES), jnp.float32),
            grid=grid,
            in_specs=[
                pl.BlockSpec(memory_space=pltpu.MemorySpace.SMEM),          # weights
                pl.BlockSpec((num, TP, _LANES), lambda p: (0, p, 0)),       # x slab
            ],
            out_specs=pl.BlockSpec((TP, _LANES), lambda p: (p, 0)),
            compiler_params=pltpu.CompilerParams(
                dimension_semantics=("parallel",)),
        )(w, xf)

        return out.reshape(-1)[:total].reshape(out_shape).astype(out_dtype)


# ---------------- pure-JAX reference (for correctness check) ----------------
def _forward_ref(layer, x):
    num = layer.num
    w = jnp.full((num,), 1.0 / num, jnp.float32)
    out = w[0] * x[0].astype(jnp.float32)
    for i in range(1, num):
        out = out + w[i] * x[i].astype(jnp.float32)
    return out.astype(x.dtype)


if __name__ == "__main__":
    key = jax.random.PRNGKey(0)
    k_layer, kx = jax.random.split(key)

    num = 6
    layer = FusionLayerPallas(num=num, key=k_layer)

    # x[i] is one (N, C, H, W) feature map to be fused: batch=2, channels=4, 16x16.
    x = jax.random.normal(kx, (num, 2, 4, 16, 16), jnp.float32)

    out = jax.block_until_ready(layer(x))
    assert out.shape == (2, 4, 16, 16), out.shape

    ref = jax.block_until_ready(_forward_ref(layer, x))
    np.testing.assert_allclose(np.asarray(out), np.asarray(ref), rtol=1e-5, atol=1e-6)
    print("KERNEL_OK")
</pallas_src>

<mosaic_0001>
module attributes {stable_mosaic.version = 11 : i64} {
  func.func @kernel(%arg0: i32, %arg1: memref<6xf32, #tpu.memory_space<smem>>, %arg2: memref<6x8x128xf32, #tpu.memory_space<vmem>>, %arg3: memref<8x128xf32, #tpu.memory_space<vmem>>) attributes {dimension_semantics = [#tpu.dimension_semantics<parallel>], iteration_bounds = array<i64: 2>, scalar_prefetch = 0 : i64, scratch_operands = 0 : i64, tpu.core_type = #tpu.core_type<tc>, window_params = [{transform_indices = @transform_0, window_bounds = array<i64: 6>}, {transform_indices = @transform_1, window_bounds = array<i64: 6, 8, 128>}, {transform_indices = @transform_2, window_bounds = array<i64: 8, 128>}]} {
    %c0 = arith.constant 0 : index
    %0 = memref.load %arg1[%c0] : memref<6xf32, #tpu.memory_space<smem>>
    %c0_0 = arith.constant 0 : index
    %c0_1 = arith.constant 0 : index
    %c0_2 = arith.constant 0 : index
    %1 = vector.load %arg2[%c0_0, %c0_1, %c0_2] : memref<6x8x128xf32, #tpu.memory_space<vmem>>, vector<1x8x128xf32>
    %2 = vector.shape_cast %1 : vector<1x8x128xf32> to vector<8x128xf32>
    %3 = vector.broadcast %0 : f32 to vector<8x128xf32>
    %4 = arith.mulf %3, %2 : vector<8x128xf32>
    %c1 = arith.constant 1 : index
    %5 = memref.load %arg1[%c1] : memref<6xf32, #tpu.memory_space<smem>>
    %c1_3 = arith.constant 1 : index
    %c0_4 = arith.constant 0 : index
    %c0_5 = arith.constant 0 : index
    %6 = vector.load %arg2[%c1_3, %c0_4, %c0_5] : memref<6x8x128xf32, #tpu.memory_space<vmem>>, vector<1x8x128xf32>
    %7 = vector.shape_cast %6 : vector<1x8x128xf32> to vector<8x128xf32>
    %8 = vector.broadcast %5 : f32 to vector<8x128xf32>
    %9 = arith.mulf %8, %7 : vector<8x128xf32>
    %10 = arith.addf %4, %9 : vector<8x128xf32>
    %c2 = arith.constant 2 : index
    %11 = memref.load %arg1[%c2] : memref<6xf32, #tpu.memory_space<smem>>
    %c2_6 = arith.constant 2 : index
    %c0_7 = arith.constant 0 : index
    %c0_8 = arith.constant 0 : index
    %12 = vector.load %arg2[%c2_6, %c0_7, %c0_8] : memref<6x8x128xf32, #tpu.memory_space<vmem>>, vector<1x8x128xf32>
    %13 = vector.shape_cast %12 : vector<1x8x128xf32> to vector<8x128xf32>
    %14 = vector.broadcast %11 : f32 to vector<8x128xf32>
    %15 = arith.mulf %14, %13 : vector<8x128xf32>
    %16 = arith.addf %10, %15 : vector<8x128xf32>
    %c3 = arith.constant 3 : index
    %17 = memref.load %arg1[%c3] : memref<6xf32, #tpu.memory_space<smem>>
    %c3_9 = arith.constant 3 : index
    %c0_10 = arith.constant 0 : index
    %c0_11 = arith.constant 0 : index
    %18 = vector.load %arg2[%c3_9, %c0_10, %c0_11] : memref<6x8x128xf32, #tpu.memory_space<vmem>>, vector<1x8x128xf32>
    %19 = vector.shape_cast %18 : vector<1x8x128xf32> to vector<8x128xf32>
    %20 = vector.broadcast %17 : f32 to vector<8x128xf32>
    %21 = arith.mulf %20, %19 : vector<8x128xf32>
    %22 = arith.addf %16, %21 : vector<8x128xf32>
    %c4 = arith.constant 4 : index
    %23 = memref.load %arg1[%c4] : memref<6xf32, #tpu.memory_space<smem>>
    %c4_12 = arith.constant 4 : index
    %c0_13 = arith.constant 0 : index
    %c0_14 = arith.constant 0 : index
    %24 = vector.load %arg2[%c4_12, %c0_13, %c0_14] : memref<6x8x128xf32, #tpu.memory_space<vmem>>, vector<1x8x128xf32>
    %25 = vector.shape_cast %24 : vector<1x8x128xf32> to vector<8x128xf32>
    %26 = vector.broadcast %23 : f32 to vector<8x128xf32>
    %27 = arith.mulf %26, %25 : vector<8x128xf32>
    %28 = arith.addf %22, %27 : vector<8x128xf32>
    %c5 = arith.constant 5 : index
    %29 = memref.load %arg1[%c5] : memref<6xf32, #tpu.memory_space<smem>>
    %c5_15 = arith.constant 5 : index
    %c0_16 = arith.constant 0 : index
    %c0_17 = arith.constant 0 : index
    %30 = vector.load %arg2[%c5_15, %c0_16, %c0_17] : memref<6x8x128xf32, #tpu.memory_space<vmem>>, vector<1x8x128xf32>
    %31 = vector.shape_cast %30 : vector<1x8x128xf32> to vector<8x128xf32>
    %32 = vector.broadcast %29 : f32 to vector<8x128xf32>
    %33 = arith.mulf %32, %31 : vector<8x128xf32>
    %34 = arith.addf %28, %33 : vector<8x128xf32>
    %c0_18 = arith.constant 0 : index
    %c0_19 = arith.constant 0 : index
    %35 = vector.load %arg3[%c0_18, %c0_19] : memref<8x128xf32, #tpu.memory_space<vmem>>, vector<8x128xf32>
    tpu.vector_store %arg3[%c0_18, %c0_19], %34 {strides = array<i32>} : memref<8x128xf32, #tpu.memory_space<vmem>>, vector<8x128xf32>,
    return
  }
  func.func @transform_0(%arg0: i32) -> i32 {
    %c0_i32 = arith.constant 0 : i32
    %c0_i32_0 = arith.constant 0 : i32
    return %c0_i32 : i32
  }
  func.func @transform_1(%arg0: i32) -> (i32, i32, i32) {
    %c0_i32 = arith.constant 0 : i32
    %c0_i32_0 = arith.constant 0 : i32
    %c0_i32_1 = arith.constant 0 : i32
    return %c0_i32, %arg0, %c0_i32_0 : i32, i32, i32
  }
  func.func @transform_2(%arg0: i32) -> (i32, i32) {
    %c0_i32 = arith.constant 0 : i32
    %c0_i32_0 = arith.constant 0 : i32
    return %arg0, %c0_i32 : i32, i32
  }
}

</mosaic_0001>

<bundles_post_ra>
// kernel: tpu_custom_call.1
= control target key start
LH: loop header
LB: loop body
LE: loop exit
PB: predicated region body
PF: predicated region fallthrough
CT: control target
= control target key end

     0   :  { %7 = vsyncpa [#allocation5], 0  ;;  %s673_s0 = inlined_call_operand.hbm [shape: f32[6], index: 0, kind: input, shape index: {}]   ;;  %s674_s1 = inlined_call_operand.hbm [shape: f32[6,16,128], index: 1, kind: input, shape index: {}]   ;;  %s675_s2 = inlined_call_operand.hbm [shape: f32[16,128], index: 2, kind: output, shape index: {}]  }
   0x1   :  { %8 = vsyncpa [#allocation3], 0 }
   0x2   :  { %10 = vsyncpa [#allocation3 + $0x1], 0 }
   0x3   :  { %11 = vsyncpa [#allocation4], 0 }
   0x4   :  { %13 = vsyncpa [#allocation4 + $0x1], 0  ;;  %s530_s9 = smov 0   ;;  %s532_s10 = smov 0  }
   0x5   :  { %s534_s11 = smov 0   ;;  %s536_s12 = smov 0  }
   0x6 LB: > { %s551_s13 = sadd.s32 4294967295, %s509_s12   ;;  %s310_s14 = sadd.s32 4294967294, %s509_s12   ;;  %s509_s12 = sphi %s536_s12, %s686_s12   ;;  %s505_s11 = sphi %s534_s11, %s685_s11   ;;  %s501_s10 = sphi %s532_s10, %s684_s10   ;;  %s497_s9 = sphi %s530_s9, %s683_s9  }
   0x7   : > { %s555_s15 = sadd.s32 1, %s509_s12   ;;  %s47_s16 = sadd.s32 1, %s505_s11 }
   0x8   : > { %s44_s17 = ssub.s32 %s509_s12, %s555_s15  ;;  %p54_p0 = scmp.ne.s32.totalorder %s505_s11, %s501_s10 }
   0x9   : > { %p45_p1 = scmp.eq.s32.totalorder %s44_s17, 0  ;;  %p55_p2 = scmp.eq.s32.totalorder %s509_s12, 0 }
   0xa   : > { %p60_p3 = scmp.ne.s32.totalorder %s501_s10, %s497_s9  ;;  %p61_p4 = scmp.eq.s32.totalorder %s551_s13, 0 }
   0xb   : > { %s567_s18 = scalar_select %p45_p1, %s505_s11, %s47_s16  }
   0xc   : > { %p569_p5 = por %p55_p2, %p54_p0  ;;  %p575_p6 = por %p61_p4, %p60_p3 }
   0xd   : > { %p84_p7 = scmp.eq.s32.totalorder %s551_s13, 1  ;;  %p90_p8 = scmp.eq.s32.totalorder %s310_s14, 1 }
   0xe   : > { %p311_p9 = scmp.ge.s32.totalorder %s509_s12, 1  ;;  %p97_p10 = scmp.lt.s32.totalorder %s509_s12, 3 }
   0xf   : > { %p582_p11 = por %p84_p7, %p54_p0  ;;  %p586_p12 = por %p90_p8, %p60_p3 }
  0x10   : > { %p590_p13 = pnand %p311_p9, %p97_p10  ;;  %s109_s26 = sshll.u32 %s673_s0, 4  ;;  %s110_s26 = int_to_ptr.hbm [resolvable:$true] %s109_s26 }
  0x11   : > { %p355_p2 = scmp.lt.s32.totalorder %s509_s12, 2  ;;  %s120_s27 = sand.u32 1, %s505_s11  }
  0x12   : > { %p342_p1 = pneg %p590_p13  ;;  %s332_s29 = smul.u32 48, %s120_s27 }
  0x13   : > { %p606_p3 = pnand %p355_p2, %p569_p5  ;;  %s511_s30 = smov [#allocation2]  }
  0x14   : > { %p343_p7 = pnand %p342_p1, %p61_p4  ;;  %s314_s3 = sshll.u32 %s509_s12, 3 }
  0x15   : > { %s124_s4 = scalar_lea.vmem [#allocation6], %s332_s29  ;;  %s128_s8 = scalar_lea.hbm %s674_s1, %s314_s3 }
  0x16   : > { %345 = dma.hbm_to_smem (!%p343_p7), %s110_s26, 16, %s511_s30, [#allocation5]  }
  0x17   : > { %s131_s5 = sshll.u32 %s124_s4, 4  ;;  %s129_s14 = sshll.u32 %s128_s8, 4  ;;  %s132_s5 = int_to_ptr.vmem [resolvable:$true] %s131_s5  ;;  %s130_s14 = int_to_ptr.hbm [resolvable:$true] %s129_s14 }
  0x18   : > { %s121_s16 = scalar_lea.sflag [#allocation3], %s120_s27  ;;  %s409_s17 = sshra.s32 %s130_s14, 4  ;;  %s410_s17 = int_to_ptr.hbm [resolvable:$true] %s409_s17 }
  0x19   : > { %s411_s19 = scalar_lea.hbm %s410_s17, 48  ;;  %p413_p8 = pneg %p606_p3 }
  0x1a   : > { %p412_p5 = scmp.ne.s32.totalorder %s410_s17, %s411_s19  ;;  %s416_s26 = scalar_lea.hbm %s674_s1, 96 }
  0x1b   : > { %p417_p1 = scmp.lt.s32.totalorder %s410_s17, %s674_s1  ;;  %p418_p2 = scmp.lt.s32.totalorder %s416_s26, %s411_s19 }
  0x1c   : > { %p414_p9 = pnand %p413_p8, %p412_p5 }
  0x1d   : > { %p419_p7 = por %p418_p2, %p417_p1 }
  0x1e   : > { %p415_p10 = pneg %p414_p9 }
  0x20   : > { %p420_p0 = pnand %p419_p7, %p415_p10 }
  0x22   : > { %423 = shalt.err (!%p420_p0)
}
  0x23   : > { %s512_s27 = smov 256   ;;  %s513_s3 = smov 128  }
  0x24   : > { %s514_s4 = smov 8   ;;  %143 = sbr.rel (%p590_p13) target bundleno = 72 (0x48), region = 28 }
  0x25   : > { %349 = dma.hbm_to_vmem [thread:$0]  (!%p606_p3), %s130_s14, 768, %s132_s5, %s121_s16, %s512_s27, %s513_s3, %s514_s4  }
  0x29   : > { %484 = dma.done.wait (%p61_p4), [#allocation5], 16  }
  0x2a   : > { %486 = vsyncadd (%p61_p4), [#allocation5], 4294967280  ;;  %s631_s6 = sand.u32 1, %s501_s10  }
  0x2b   : > { %s333_s7 = smul.u32 48, %s631_s6  ;;  %s151_s8 = scalar_lea.sflag [#allocation3], %s631_s6 }
  0x2d   : > { %s154_s17 = scalar_lea.vmem [#allocation6], %s333_s7 }
  0x2e   : > { %488 = dma.done.wait (%p575_p6), %s151_s8, 768  }
  0x2f   : > { %490 = vsyncadd (%p575_p6), %s151_s8, 4294966528 }
  0x30   : > { %160 = sfence }
  0x31   : > { %s177_s23 = sld [smem:[#allocation2]]  ;;  %v178_v0 = vld [vmem:[%s154_s17] sm:$0xff]  ;;  %v319_v1 = vld [vmem:[%s154_s17 + $0x8] sm:$0xff]  ;;  %v321_v3 = vld [vmem:[%s154_s17 + $0x10] sm:$0xff]  ;;  %s317_s24 = sshll.u32 %s631_s6, 3 }
  0x32   : > { %s318_s28 = sld [smem:[#allocation2 + $0x1]]  ;;  %v323_v6 = vld [vmem:[%s154_s17 + $0x18] sm:$0xff]  ;;  %v325_v11 = vld [vmem:[%s154_s17 + $0x20] sm:$0xff]  ;;  %s329_s20 = sshll.u32 %s551_s13, 3  ;;  %v327_v15 = vld [vmem:[%s154_s17 + $0x28] sm:$0xff] }
  0x33   : > { %s320_s5 = sld [smem:[#allocation2 + $0x2]]  ;;  %s223_s29 = scalar_lea.hbm %s675_s2, %s329_s20 }
  0x34   : > { %s322_s14 = sld [smem:[#allocation2 + $0x3]]  ;;  %s176_s30 = scalar_lea.vmem [#allocation7], %s317_s24 }
  0x35   : > { %s324_s16 = sld [smem:[#allocation2 + $0x4]]  ;;  %s225_s27 = sshll.u32 %s176_s30, 4  ;;  %s226_s27 = int_to_ptr.vmem [resolvable:$true] %s225_s27 }
  0x36   : > { %s326_s19 = sld [smem:[#allocation2 + $0x5]]  ;;  %s227_s3 = sshll.u32 %s223_s29, 4  ;;  %s228_s3 = int_to_ptr.hbm [resolvable:$true] %s227_s3 }
  0x37   : > { %v179_v2 = vstv %s177_s23  ;;  %s213_s13 = scalar_lea.sflag [#allocation4], %s631_s6  ;;  %s453_s4 = sshra.s32 %s228_s3, 4  ;;  %s454_s4 = int_to_ptr.hbm [resolvable:$true] %s453_s4 }
  0x38   : > { %v180_v4 = vmul.f32 %v179_v2, %v178_v0  ;;  %v184_v5 = vstv %s318_s28  ;;  %s455_s7 = scalar_lea.hbm %s454_s4, 8  ;;  %s459_s23 = scalar_lea.hbm %s675_s2, 16 }
  0x39   : > { %v185_v7 = vmul.f32 %v319_v1, %v184_v5  ;;  %v190_v8 = vstv %s320_s5  ;;  %p456_p4 = scmp.ne.s32.totalorder %s454_s4, %s455_s7  ;;  %p460_p0 = scmp.lt.s32.totalorder %s454_s4, %s675_s2 }
  0x3a   : > { %v191_v9 = vmul.f32 %v321_v3, %v190_v8  ;;  %v196_v10 = vstv %s322_s14  ;;  %p461_p3 = scmp.lt.s32.totalorder %s459_s23, %s455_s7 }
  0x3b   : > { %v186_v12 = vadd.f32 %v185_v7, %v180_v4  ;;  %v197_v13 = vmul.f32 %v323_v6, %v196_v10  ;;  %v202_v14 = vstv %s324_s16  ;;  %p457_p6 = pnand %p456_p4, %p582_p11 }
  0x3c   : > { %v208_v16 = vstv %s326_s19  ;;  %v203_v18 = vmul.f32 %v325_v11, %v202_v14  ;;  %p462_p5 = por %p461_p3, %p460_p0 }
  0x3d   : > { %v192_v17 = vadd.f32 %v191_v9, %v186_v12  ;;  %v209_v20 = vmul.f32 %v327_v15, %v208_v16  ;;  %p458_p13 = pneg %p457_p6 }
  0x3f   : > { %v198_v19 = vadd.f32 %v197_v13, %v192_v17  ;;  %p463_p8 = pnand %p462_p5, %p458_p13 }
  0x41   : > { %v204_v21 = vadd.f32 %v203_v18, %v198_v19 }
  0x43   : > { %v210_v22 = vadd.f32 %v209_v20, %v204_v21 }
  0x45   : > { %211 = vst [vmem:[%s176_s30] sm:$0xff] %v210_v22 }
  0x46   : > { %466 = shalt.err (!%p463_p8)
}
  0x47   : > { %340 = dma.vmem_to_hbm [thread:$0]  (%p582_p11), %s226_s27, 128, %s228_s3, %s213_s13  }
  0x48 PF: > { %s239_s6 = sand.u32 1, %s497_s9   ;;  %p682_p9 = scmp.ge.s32.totalorder %s509_s12, 2 }
  0x49   : > { %s240_s14 = scalar_lea.sflag [#allocation4], %s239_s6 }
  0x4a   : > { %p351_p10 = pnand %p682_p9, %p586_p12 }
  0x4c   : > { %p352_p1 = pneg %p351_p10 }
  0x4e   : > { %492 = dma.done.wait (%p352_p1), %s240_s14, 128  }
  0x4f   : > { %494 = vsyncadd (%p352_p1), %s240_s14, 4294967168  ;;  %p16_p2 = scmp.ge.s32.totalorder %s555_s15, 4   ;;  %s683_s9 = smov %s501_s10 }
  0x50   : > { %s684_s10 = smov %s505_s11  ;;  %s685_s11 = smov %s567_s18 }
  0x51   : > { %s686_s12 = smov %s555_s15  ;;  %18 = sbr.rel (!%p16_p2) target bundleno = 6 (0x6), region = 83 }
  0x56   :  { %246 = vsyncpa [#allocation3], 1 }
  0x57   :  { %248 = vsyncpa [#allocation3 + $0x1], 1 }
  0x58   :  { %249 = vsyncpa [#allocation4], 1 }
  0x59   :  { %251 = vsyncpa [#allocation4 + $0x1], 1 }
  0x5a   :  { %252 = vsyncpa [#allocation5], 1 }
  0x5b   :  { %254 = vsyncpa [#allocation5 + $0x1], 1 }

</bundles_post_ra>
